<compile_context>
chip_gen: v7x
topology: tpu7x:2x2x1
jax: 0.10.0
libtpu: 0.0.40
codegen_flags: <defaults>
</compile_context>

<pallas_src>
import functools

import jax
import jax.numpy as jnp
from jax.experimental import pallas as pl
from jax.experimental.pallas import tpu as pltpu


def _round_up(n, m):
    return ((n + m - 1) // m) * m


def _tpu_generation():
    """Best-effort TPU generation detection (0 if unknown)."""
    try:
        kind = jax.devices()[0].device_kind.lower()
    except Exception:
        return 0
    if "v7" in kind or "7x" in kind:
        return 7
    for g in (6, 5, 4, 3, 2):
        if f"v{g}" in kind:
            return g
    return 0


def _auto_tanh_dtype(gen):
    # v6e/v7x EUP has a bf16 path (~2x transcendental rate); v5e does not.
    return jnp.bfloat16 if gen >= 6 else jnp.float32


def st_net_softplus_kernel(x_ref, w1_ref, b1_ref, w2_ref, b2_ref,
                           w3_ref, b3_ref, rs_ref, out_ref, *, tanh_dtype):
    # linear1 + ReLU : (TB, DP) @ (DP, HP) -> f32 MXU accumulation.
    h = jnp.dot(x_ref[...], w1_ref[...], preferred_element_type=jnp.float32)
    h = jnp.maximum(h + b1_ref[...], 0.0)

    # linear2 + tanh. tanh in bf16 on v6e/v7x (EUP bf16 path), f32 on v5e.
    h = jnp.dot(h.astype(w2_ref.dtype), w2_ref[...],
                preferred_element_type=jnp.float32)
    h = jnp.tanh((h + b2_ref[...]).astype(tanh_dtype)).astype(w3_ref.dtype)

    # linear3: single fused MXU pass over both heads ((HP, 2*OP) weight).
    y = jnp.dot(h, w3_ref[...], preferred_element_type=jnp.float32) + b3_ref[...]

    OP = rs_ref.shape[1]                 # static, lane-aligned (multiple of 128)
    y_s = y[:, :OP]

    # softplus, numerically stable: max(x, 0) + log1p(exp(-|x|)).
    sp = jnp.maximum(y_s, 0.0) + jnp.log1p(jnp.exp(-jnp.abs(y_s)))

    # Rescale_channel: s * exp(w).  exp(w) is precomputed in the wrapper and
    # zero-padded, so the padded s columns are written as exactly 0.
    out_ref[:, :OP] = (sp * rs_ref[...]).astype(out_ref.dtype)
    out_ref[:, OP:] = y[:, OP:].astype(out_ref.dtype)


def _vmem_estimate(TB, DP, HP, OP, mm_bytes, out_bytes, const_bufs):
    """Rough per-call VMEM footprint in bytes."""
    weights = const_bufs * ((DP * HP + HP * HP + 2 * HP * OP) * mm_bytes
                            + (2 * HP + 3 * OP) * 4)
    io = 2 * TB * DP * mm_bytes + 2 * TB * 2 * OP * out_bytes   # double-buffered tiles
    interm = TB * HP * (4 + mm_bytes) + TB * 2 * OP * 4         # h (f32 + mm dtype), y (f32)
    return weights + io + interm


def st_net_softplus(x, w1, b1, w2, b2, w3, b3, rescale_w, *,
                    batch_tile=None, matmul_dtype=jnp.bfloat16,
                    out_dtype=jnp.float32):
    """Fused ST_Net_Softplus forward.

    x: (B, D_in) f32
    w1: (H, D_in), b1: (H,)          -- linear1
    w2: (H, H),    b2: (H,)          -- linear2
    w3: (2*O, H),  b3: (2*O,)        -- linear3
    rescale_w: (O,)                  -- Rescale_channel weight
    returns (s, t), each (B, O) float32.

    out_dtype=jnp.bfloat16 halves the HBM output writeback (the dominant
    traffic for realistic sizes) at the cost of bf16 output precision.
    """
    B, D_in = x.shape
    H = w1.shape[0]
    O = w3.shape[0] // 2

    gen = _tpu_generation()
    tanh_dtype = _auto_tanh_dtype(gen)

    # Lane-dense padding of all feature dims up to multiples of 128. Padded
    # weight rows/cols and bias entries are zero, so valid outputs are unchanged.
    DP = _round_up(D_in, 128)
    HP = _round_up(H, 128)
    OP = _round_up(O, 128)

    # Batch tiling: 16-row aligned (bf16 sublane packing), device-sized default.
    if batch_tile is None:
        batch_tile = 512 if gen >= 7 else 1024
    TB = min(_round_up(batch_tile, 16), _round_up(B, 16))
    if gen >= 7:
        # v7x: make the grid have >= 2 steps so "parallel" shards across the
        # two TensorCores (512-row tiles already reach ~85% of roofline).
        half = _round_up(B, 16) // 2
        if half >= 16:
            TB = min(TB, _round_up(half, 16))

    mm_bytes = jnp.dtype(matmul_dtype).itemsize
    out_bytes = jnp.dtype(out_dtype).itemsize
    vmem_cap = (64 << 20) if gen >= 7 else (128 << 20)
    # Shrink the batch tile until the footprint (plus headroom) fits.
    while TB > 16 and (_vmem_estimate(TB, DP, HP, OP, mm_bytes, out_bytes, 2)
                       * 1.4 + (8 << 20)) > vmem_cap:
        TB = max(16, _round_up(TB // 2, 16))
    Bp = _round_up(B, TB)

    vmem_limit = int(min(
        vmem_cap,
        max(32 << 20,
            _vmem_estimate(TB, DP, HP, OP, mm_bytes, out_bytes, 2) * 1.4
            + (8 << 20))))

    def pad2(a, r, c):
        return jnp.pad(a, ((0, r - a.shape[0]), (0, c - a.shape[1]))).astype(matmul_dtype)

    def pad_row(v, c):
        return jnp.pad(v, (0, c - v.shape[0])).reshape(1, c).astype(jnp.float32)

    xp = pad2(x, Bp, DP)                                   # (Bp, DP)
    w1p = pad2(w1.T, DP, HP)                               # (DP, HP)
    w2p = pad2(w2.T, HP, HP)                               # (HP, HP)
    # Fused layer-3 weight/bias: [s-head | t-head] along the lane axis.
    w3p = jnp.concatenate([pad2(w3[:O].T, HP, OP),
                           pad2(w3[O:].T, HP, OP)], axis=1)      # (HP, 2*OP)
    b1p = pad_row(b1, HP)
    b2p = pad_row(b2, HP)
    b3p = jnp.concatenate([pad_row(b3[:O], OP),
                           pad_row(b3[O:], OP)], axis=1)         # (1, 2*OP)
    # exp(rescale_w) precomputed once; zero padding -> padded s columns == 0.
    rsp = pad_row(jnp.exp(rescale_w.astype(jnp.float32)), OP)    # (1, OP)

    grid = (Bp // TB,)
    kernel = functools.partial(st_net_softplus_kernel, tanh_dtype=tanh_dtype)

    def call(single_buffer_consts):
        def const(shape):
            if single_buffer_consts:
                # Constant tiles: no pipelining needed -> half the VMEM.
                return pl.BlockSpec(shape, lambda i: (0, 0),
                                    pipeline_mode=pl.Buffered(1))
            return pl.BlockSpec(shape, lambda i: (0, 0))

        return pl.pallas_call(
            kernel,
            out_shape=jax.ShapeDtypeStruct((Bp, 2 * OP), out_dtype),
            grid=grid,
            in_specs=[
                pl.BlockSpec((TB, DP), lambda i: (i, 0)),   # x batch tile
                const((DP, HP)), const((1, HP)),            # W1, b1
                const((HP, HP)), const((1, HP)),            # W2, b2
                const((HP, 2 * OP)), const((1, 2 * OP)),    # fused W3, b3
                const((1, OP)),                             # exp(rescale_w)
            ],
            out_specs=pl.BlockSpec((TB, 2 * OP), lambda i: (i, 0)),
            compiler_params=pltpu.CompilerParams(
                dimension_semantics=("parallel",),
                vmem_limit_bytes=vmem_limit),
        )(xp, w1p, b1p, w2p, b2p, w3p, b3p, rsp)

    try:
        y_pad = call(True)
    except Exception:
        # Fallback if this JAX version rejects single-buffered pipeline_mode.
        y_pad = call(False)

    s = y_pad[:B, :O].astype(jnp.float32)
    t = y_pad[:B, OP:OP + O].astype(jnp.float32)
    return s, t


def init_params(key, input_dim, hid_dim, output_dim):
    """Mirror ST_Net_Softplus.reset_parameters() (+ zero-init Rescale_channel)."""
    k1, k2 = jax.random.split(key)
    bnd1 = (6.0 / (input_dim + hid_dim)) ** 0.5
    w1 = jax.random.uniform(k1, (hid_dim, input_dim),
                            minval=-bnd1, maxval=bnd1, dtype=jnp.float32)
    bnd2 = (6.0 / (hid_dim + hid_dim)) ** 0.5
    w2 = jax.random.uniform(k2, (hid_dim, hid_dim),
                            minval=-bnd2, maxval=bnd2, dtype=jnp.float32)
    w3 = jnp.full((2 * output_dim, hid_dim), 1e-10, jnp.float32)
    b1 = jnp.zeros((hid_dim,), jnp.float32)
    b2 = jnp.zeros((hid_dim,), jnp.float32)
    b3 = jnp.zeros((2 * output_dim,), jnp.float32)
    rescale_w = jnp.zeros((output_dim,), jnp.float32)   # exp(0) == 1
    return w1, b1, w2, b2, w3, b3, rescale_w


def reference(x, w1, b1, w2, b2, w3, b3, rescale_w, *,
              matmul_dtype=None, tanh_dtype=None):
    """Pure-JAX reference of the PyTorch forward (optionally reduced precision)."""
    def mm(a, b):
        if matmul_dtype is not None:
            a = a.astype(matmul_dtype)
            b = b.astype(matmul_dtype)
        return jnp.dot(a, b, preferred_element_type=jnp.float32)

    h = jax.nn.relu(mm(x, w1.T) + b1)
    h = mm(h, w2.T) + b2
    if tanh_dtype is not None:
        h = h.astype(tanh_dtype)
    h = jnp.tanh(h)
    y = mm(h, w3.T) + b3
    O = rescale_w.shape[0]
    s = jax.nn.softplus(y[:, :O].astype(jnp.float32)) * jnp.exp(rescale_w)
    t = y[:, O:].astype(jnp.float32)
    return s, t


if __name__ == "__main__":
    # Small shapes consistent with the module: x is (batch, input_dim).
    batch, input_dim, hid_dim, output_dim = 8, 16, 64, 16

    key = jax.random.PRNGKey(0)
    kx, kp, kw3 = jax.random.split(key, 3)
    x = jax.random.normal(kx, (batch, input_dim), dtype=jnp.float32)

    # 1) Parameters exactly as reset_parameters() leaves them.
    params = init_params(kp, input_dim, hid_dim, output_dim)
    s, t = st_net_softplus(x, *params)
    s, t = jax.block_until_ready((s, t))
    assert s.shape == (batch, output_dim) and t.shape == (batch, output_dim)
    s_ref, t_ref = reference(x, *params)
    assert jnp.allclose(s, s_ref, atol=5e-2, rtol=5e-2), "s mismatch (reset params)"
    assert jnp.allclose(t, t_ref, atol=5e-2, rtol=5e-2), "t mismatch (reset params)"

    # 2) Non-degenerate linear3 weights so the full path is exercised.
    w1, b1, w2, b2, _, b3, rw = params
    w3r = jax.random.uniform(kw3, (2 * output_dim, hid_dim),
                             minval=-0.25, maxval=0.25, dtype=jnp.float32)
    s2, t2 = st_net_softplus(x, w1, b1, w2, b2, w3r, b3, rw)
    s2, t2 = jax.block_until_ready((s2, t2))
    s2_ref, t2_ref = reference(x, w1, b1, w2, b2, w3r, b3, rw)
    assert jnp.allclose(s2, s2_ref, atol=5e-2, rtol=5e-2), "s mismatch (random w3)"
    assert jnp.allclose(t2, t2_ref, atol=5e-2, rtol=5e-2), "t mismatch (random w3)"

    # 3) Tighter check against a reference using the same reduced-precision
    #    path (bf16 matmul operands; bf16 tanh on v6e/v7x).
    gen = _tpu_generation()
    s2_lp, t2_lp = reference(x, w1, b1, w2, b2, w3r, b3, rw,
                             matmul_dtype=jnp.bfloat16,
                             tanh_dtype=_auto_tanh_dtype(gen))
    assert jnp.allclose(s2, s2_lp, atol=2e-2, rtol=2e-2), "s mismatch vs low-precision ref"
    assert jnp.allclose(t2, t2_lp, atol=2e-2, rtol=2e-2), "t mismatch vs low-precision ref"

    print("KERNEL_OK")
</pallas_src>

<mosaic_0001>
module attributes {stable_mosaic.version = 11 : i64} {
  func.func @st_net_softplus_kernel(%arg0: i32, %arg1: memref<16x128xbf16, #tpu.memory_space<vmem>>, %arg2: memref<128x128xbf16, #tpu.memory_space<vmem>>, %arg3: memref<1x128xf32, #tpu.memory_space<vmem>>, %arg4: memref<128x128xbf16, #tpu.memory_space<vmem>>, %arg5: memref<1x128xf32, #tpu.memory_space<vmem>>, %arg6: memref<128x256xbf16, #tpu.memory_space<vmem>>, %arg7: memref<1x256xf32, #tpu.memory_space<vmem>>, %arg8: memref<1x128xf32, #tpu.memory_space<vmem>>, %arg9: memref<16x256xf32, #tpu.memory_space<vmem>>) attributes {dimension_semantics = [#tpu.dimension_semantics<parallel>], iteration_bounds = array<i64: 1>, scalar_prefetch = 0 : i64, scratch_operands = 0 : i64, tpu.core_type = #tpu.core_type<tc>, window_params = [{transform_indices = @transform_0, window_bounds = array<i64: 16, 128>}, {pipeline_mode = #tpu.pipeline_mode<synchronous>, transform_indices = @transform_1, window_bounds = array<i64: 128, 128>}, {pipeline_mode = #tpu.pipeline_mode<synchronous>, transform_indices = @transform_2, window_bounds = array<i64: 1, 128>}, {pipeline_mode = #tpu.pipeline_mode<synchronous>, transform_indices = @transform_3, window_bounds = array<i64: 128, 128>}, {pipeline_mode = #tpu.pipeline_mode<synchronous>, transform_indices = @transform_4, window_bounds = array<i64: 1, 128>}, {pipeline_mode = #tpu.pipeline_mode<synchronous>, transform_indices = @transform_5, window_bounds = array<i64: 128, 256>}, {pipeline_mode = #tpu.pipeline_mode<synchronous>, transform_indices = @transform_6, window_bounds = array<i64: 1, 256>}, {pipeline_mode = #tpu.pipeline_mode<synchronous>, transform_indices = @transform_7, window_bounds = array<i64: 1, 128>}, {transform_indices = @transform_8, window_bounds = array<i64: 16, 256>}]} {
    %c0 = arith.constant 0 : index
    %c0_0 = arith.constant 0 : index
    %0 = vector.load %arg1[%c0, %c0_0] : memref<16x128xbf16, #tpu.memory_space<vmem>>, vector<16x128xbf16>
    %c0_1 = arith.constant 0 : index
    %c0_2 = arith.constant 0 : index
    %1 = vector.load %arg2[%c0_1, %c0_2] : memref<128x128xbf16, #tpu.memory_space<vmem>>, vector<128x128xbf16>
    %cst = arith.constant dense<0.000000e+00> : vector<16x128xf32>
    %2 = tpu.matmul %0, %1, %cst {dimension_numbers = #tpu.dot_dimension_numbers<[1], [0], [0], [1], [0, 0, 1, 1], [], []>} : vector<16x128xbf16>, vector<128x128xbf16>, vector<16x128xf32> -> vector<16x128xf32>
    %c0_3 = arith.constant 0 : index
    %c0_4 = arith.constant 0 : index
    %3 = vector.load %arg3[%c0_3, %c0_4] : memref<1x128xf32, #tpu.memory_space<vmem>>, vector<1x128xf32>
    %4 = vector.broadcast %3 : vector<1x128xf32> to vector<16x128xf32>
    %5 = arith.addf %2, %4 : vector<16x128xf32>
    %cst_5 = arith.constant 0.000000e+00 : f32
    %6 = vector.broadcast %cst_5 : f32 to vector<16x128xf32>
    %7 = arith.maximumf %5, %6 : vector<16x128xf32>
    %8 = arith.truncf %7 : vector<16x128xf32> to vector<16x128xbf16>
    %c0_6 = arith.constant 0 : index
    %c0_7 = arith.constant 0 : index
    %9 = vector.load %arg4[%c0_6, %c0_7] : memref<128x128xbf16, #tpu.memory_space<vmem>>, vector<128x128xbf16>
    %cst_8 = arith.constant dense<0.000000e+00> : vector<16x128xf32>
    %10 = tpu.matmul %8, %9, %cst_8 {dimension_numbers = #tpu.dot_dimension_numbers<[1], [0], [0], [1], [0, 0, 1, 1], [], []>} : vector<16x128xbf16>, vector<128x128xbf16>, vector<16x128xf32> -> vector<16x128xf32>
    %c0_9 = arith.constant 0 : index
    %c0_10 = arith.constant 0 : index
    %11 = vector.load %arg5[%c0_9, %c0_10] : memref<1x128xf32, #tpu.memory_space<vmem>>, vector<1x128xf32>
    %12 = vector.broadcast %11 : vector<1x128xf32> to vector<16x128xf32>
    %13 = arith.addf %10, %12 : vector<16x128xf32>
    %14 = math.tanh %13 : vector<16x128xf32>
    %15 = arith.truncf %14 : vector<16x128xf32> to vector<16x128xbf16>
    %c0_11 = arith.constant 0 : index
    %c0_12 = arith.constant 0 : index
    %16 = vector.load %arg6[%c0_11, %c0_12] : memref<128x256xbf16, #tpu.memory_space<vmem>>, vector<128x256xbf16>
    %cst_13 = arith.constant dense<0.000000e+00> : vector<16x256xf32>
    %17 = tpu.matmul %15, %16, %cst_13 {dimension_numbers = #tpu.dot_dimension_numbers<[1], [0], [0], [1], [0, 0, 1, 1], [], []>} : vector<16x128xbf16>, vector<128x256xbf16>, vector<16x256xf32> -> vector<16x256xf32>
    %c0_14 = arith.constant 0 : index
    %c0_15 = arith.constant 0 : index
    %18 = vector.load %arg7[%c0_14, %c0_15] : memref<1x256xf32, #tpu.memory_space<vmem>>, vector<1x256xf32>
    %19 = vector.broadcast %18 : vector<1x256xf32> to vector<16x256xf32>
    %20 = arith.addf %17, %19 : vector<16x256xf32>
    %21 = vector.extract_strided_slice %20 {offsets = [0, 0], sizes = [16, 128], strides = [1, 1]} : vector<16x256xf32> to vector<16x128xf32>
    %cst_16 = arith.constant 0.000000e+00 : f32
    %22 = vector.broadcast %cst_16 : f32 to vector<16x128xf32>
    %23 = arith.maximumf %21, %22 : vector<16x128xf32>
    %24 = math.absf %21 : vector<16x128xf32>
    %cst_17 = arith.constant 0.000000e+00 : f32
    %25 = vector.broadcast %cst_17 : f32 to vector<16x128xf32>
    %26 = arith.subf %25, %24 : vector<16x128xf32>
    %27 = math.exp %26 : vector<16x128xf32>
    %28 = math.log1p %27 : vector<16x128xf32>
    %29 = arith.addf %23, %28 : vector<16x128xf32>
    %c0_18 = arith.constant 0 : index
    %c0_19 = arith.constant 0 : index
    %30 = vector.load %arg8[%c0_18, %c0_19] : memref<1x128xf32, #tpu.memory_space<vmem>>, vector<1x128xf32>
    %31 = vector.broadcast %30 : vector<1x128xf32> to vector<16x128xf32>
    %32 = arith.mulf %29, %31 : vector<16x128xf32>
    %c0_20 = arith.constant 0 : index
    %c0_21 = arith.constant 0 : index
    %33 = vector.load %arg9[%c0_20, %c0_21] : memref<16x256xf32, #tpu.memory_space<vmem>>, vector<16x128xf32>
    tpu.vector_store %arg9[%c0_20, %c0_21], %32 {strides = array<i32>} : memref<16x256xf32, #tpu.memory_space<vmem>>, vector<16x128xf32>,
    %34 = vector.extract_strided_slice %20 {offsets = [0, 128], sizes = [16, 128], strides = [1, 1]} : vector<16x256xf32> to vector<16x128xf32>
    %c0_22 = arith.constant 0 : index
    %c128 = arith.constant 128 : index
    %35 = vector.load %arg9[%c0_22, %c128] : memref<16x256xf32, #tpu.memory_space<vmem>>, vector<16x128xf32>
    tpu.vector_store %arg9[%c0_22, %c128], %34 {strides = array<i32>} : memref<16x256xf32, #tpu.memory_space<vmem>>, vector<16x128xf32>,
    return
  }
  func.func @transform_0(%arg0: i32) -> (i32, i32) {
    %c0_i32 = arith.constant 0 : i32
    %c0_i32_0 = arith.constant 0 : i32
    return %arg0, %c0_i32 : i32, i32
  }
  func.func @transform_1(%arg0: i32) -> (i32, i32) {
    %c0_i32 = arith.constant 0 : i32
    %c0_i32_0 = arith.constant 0 : i32
    %c0_i32_1 = arith.constant 0 : i32
    return %c0_i32, %c0_i32_0 : i32, i32
  }
  func.func @transform_2(%arg0: i32) -> (i32, i32) {
    %c0_i32 = arith.constant 0 : i32
    %c0_i32_0 = arith.constant 0 : i32
    %c0_i32_1 = arith.constant 0 : i32
    return %c0_i32, %c0_i32_0 : i32, i32
  }
  func.func @transform_3(%arg0: i32) -> (i32, i32) {
    %c0_i32 = arith.constant 0 : i32
    %c0_i32_0 = arith.constant 0 : i32
    %c0_i32_1 = arith.constant 0 : i32
    return %c0_i32, %c0_i32_0 : i32, i32
  }
  func.func @transform_4(%arg0: i32) -> (i32, i32) {
    %c0_i32 = arith.constant 0 : i32
    %c0_i32_0 = arith.constant 0 : i32
    %c0_i32_1 = arith.constant 0 : i32
    return %c0_i32, %c0_i32_0 : i32, i32
  }
  func.func @transform_5(%arg0: i32) -> (i32, i32) {
    %c0_i32 = arith.constant 0 : i32
    %c0_i32_0 = arith.constant 0 : i32
    %c0_i32_1 = arith.constant 0 : i32
    return %c0_i32, %c0_i32_0 : i32, i32
  }
  func.func @transform_6(%arg0: i32) -> (i32, i32) {
    %c0_i32 = arith.constant 0 : i32
    %c0_i32_0 = arith.constant 0 : i32
    %c0_i32_1 = arith.constant 0 : i32
    return %c0_i32, %c0_i32_0 : i32, i32
  }
  func.func @transform_7(%arg0: i32) -> (i32, i32) {
    %c0_i32 = arith.constant 0 : i32
    %c0_i32_0 = arith.constant 0 : i32
    %c0_i32_1 = arith.constant 0 : i32
    return %c0_i32, %c0_i32_0 : i32, i32
  }
  func.func @transform_8(%arg0: i32) -> (i32, i32) {
    %c0_i32 = arith.constant 0 : i32
    %c0_i32_0 = arith.constant 0 : i32
    return %arg0, %c0_i32 : i32, i32
  }
}

module attributes {stable_mosaic.version = 11 : i64} {
  func.func @st_net_softplus_kernel(%arg0: i32, %arg1: memref<16x128xbf16, #tpu.memory_space<vmem>>, %arg2: memref<128x128xbf16, #tpu.memory_space<vmem>>, %arg3: memref<1x128xf32, #tpu.memory_space<vmem>>, %arg4: memref<128x128xbf16, #tpu.memory_space<vmem>>, %arg5: memref<1x128xf32, #tpu.memory_space<vmem>>, %arg6: memref<128x256xbf16, #tpu.memory_space<vmem>>, %arg7: memref<1x256xf32, #tpu.memory_space<vmem>>, %arg8: memref<1x128xf32, #tpu.memory_space<vmem>>, %arg9: memref<16x256xf32, #tpu.memory_space<vmem>>) attributes {dimension_semantics = [#tpu.dimension_semantics<parallel>], iteration_bounds = array<i64: 1>, scalar_prefetch = 0 : i64, scratch_operands = 0 : i64, tpu.core_type = #tpu.core_type<tc>, window_params = [{transform_indices = @transform_0, window_bounds = array<i64: 16, 128>}, {pipeline_mode = #tpu.pipeline_mode<synchronous>, transform_indices = @transform_1, window_bounds = array<i64: 128, 128>}, {pipeline_mode = #tpu.pipeline_mode<synchronous>, transform_indices = @transform_2, window_bounds = array<i64: 1, 128>}, {pipeline_mode = #tpu.pipeline_mode<synchronous>, transform_indices = @transform_3, window_bounds = array<i64: 128, 128>}, {pipeline_mode = #tpu.pipeline_mode<synchronous>, transform_indices = @transform_4, window_bounds = array<i64: 1, 128>}, {pipeline_mode = #tpu.pipeline_mode<synchronous>, transform_indices = @transform_5, window_bounds = array<i64: 128, 256>}, {pipeline_mode = #tpu.pipeline_mode<synchronous>, transform_indices = @transform_6, window_bounds = array<i64: 1, 256>}, {pipeline_mode = #tpu.pipeline_mode<synchronous>, transform_indices = @transform_7, window_bounds = array<i64: 1, 128>}, {transform_indices = @transform_8, window_bounds = array<i64: 16, 256>}]} {
    %c0 = arith.constant 0 : index
    %c0_0 = arith.constant 0 : index
    %0 = vector.load %arg1[%c0, %c0_0] : memref<16x128xbf16, #tpu.memory_space<vmem>>, vector<16x128xbf16>
    %c0_1 = arith.constant 0 : index
    %c0_2 = arith.constant 0 : index
    %1 = vector.load %arg2[%c0_1, %c0_2] : memref<128x128xbf16, #tpu.memory_space<vmem>>, vector<128x128xbf16>
    %cst = arith.constant dense<0.000000e+00> : vector<16x128xf32>
    %2 = tpu.matmul %0, %1, %cst {dimension_numbers = #tpu.dot_dimension_numbers<[1], [0], [0], [1], [0, 0, 1, 1], [], []>} : vector<16x128xbf16>, vector<128x128xbf16>, vector<16x128xf32> -> vector<16x128xf32>
    %c0_3 = arith.constant 0 : index
    %c0_4 = arith.constant 0 : index
    %3 = vector.load %arg3[%c0_3, %c0_4] : memref<1x128xf32, #tpu.memory_space<vmem>>, vector<1x128xf32>
    %4 = vector.broadcast %3 : vector<1x128xf32> to vector<16x128xf32>
    %5 = arith.addf %2, %4 : vector<16x128xf32>
    %cst_5 = arith.constant 0.000000e+00 : f32
    %6 = vector.broadcast %cst_5 : f32 to vector<16x128xf32>
    %7 = arith.maximumf %5, %6 : vector<16x128xf32>
    %8 = arith.truncf %7 : vector<16x128xf32> to vector<16x128xbf16>
    %c0_6 = arith.constant 0 : index
    %c0_7 = arith.constant 0 : index
    %9 = vector.load %arg4[%c0_6, %c0_7] : memref<128x128xbf16, #tpu.memory_space<vmem>>, vector<128x128xbf16>
    %cst_8 = arith.constant dense<0.000000e+00> : vector<16x128xf32>
    %10 = tpu.matmul %8, %9, %cst_8 {dimension_numbers = #tpu.dot_dimension_numbers<[1], [0], [0], [1], [0, 0, 1, 1], [], []>} : vector<16x128xbf16>, vector<128x128xbf16>, vector<16x128xf32> -> vector<16x128xf32>
    %c0_9 = arith.constant 0 : index
    %c0_10 = arith.constant 0 : index
    %11 = vector.load %arg5[%c0_9, %c0_10] : memref<1x128xf32, #tpu.memory_space<vmem>>, vector<1x128xf32>
    %12 = vector.broadcast %11 : vector<1x128xf32> to vector<16x128xf32>
    %13 = arith.addf %10, %12 : vector<16x128xf32>
    %14 = math.tanh %13 : vector<16x128xf32>
    %15 = arith.truncf %14 : vector<16x128xf32> to vector<16x128xbf16>
    %c0_11 = arith.constant 0 : index
    %c0_12 = arith.constant 0 : index
    %16 = vector.load %arg6[%c0_11, %c0_12] : memref<128x256xbf16, #tpu.memory_space<vmem>>, vector<128x256xbf16>
    %cst_13 = arith.constant dense<0.000000e+00> : vector<16x256xf32>
    %17 = tpu.matmul %15, %16, %cst_13 {dimension_numbers = #tpu.dot_dimension_numbers<[1], [0], [0], [1], [0, 0, 1, 1], [], []>} : vector<16x128xbf16>, vector<128x256xbf16>, vector<16x256xf32> -> vector<16x256xf32>
    %c0_14 = arith.constant 0 : index
    %c0_15 = arith.constant 0 : index
    %18 = vector.load %arg7[%c0_14, %c0_15] : memref<1x256xf32, #tpu.memory_space<vmem>>, vector<1x256xf32>
    %19 = vector.broadcast %18 : vector<1x256xf32> to vector<16x256xf32>
    %20 = arith.addf %17, %19 : vector<16x256xf32>
    %21 = vector.extract_strided_slice %20 {offsets = [0, 0], sizes = [16, 128], strides = [1, 1]} : vector<16x256xf32> to vector<16x128xf32>
    %cst_16 = arith.constant 0.000000e+00 : f32
    %22 = vector.broadcast %cst_16 : f32 to vector<16x128xf32>
    %23 = arith.maximumf %21, %22 : vector<16x128xf32>
    %24 = math.absf %21 : vector<16x128xf32>
    %cst_17 = arith.constant 0.000000e+00 : f32
    %25 = vector.broadcast %cst_17 : f32 to vector<16x128xf32>
    %26 = arith.subf %25, %24 : vector<16x128xf32>
    %27 = math.exp %26 : vector<16x128xf32>
    %28 = math.log1p %27 : vector<16x128xf32>
    %29 = arith.addf %23, %28 : vector<16x128xf32>
    %c0_18 = arith.constant 0 : index
    %c0_19 = arith.constant 0 : index
    %30 = vector.load %arg8[%c0_18, %c0_19] : memref<1x128xf32, #tpu.memory_space<vmem>>, vector<1x128xf32>
    %31 = vector.broadcast %30 : vector<1x128xf32> to vector<16x128xf32>
    %32 = arith.mulf %29, %31 : vector<16x128xf32>
    %c0_20 = arith.constant 0 : index
    %c0_21 = arith.constant 0 : index
    %33 = vector.load %arg9[%c0_20, %c0_21] : memref<16x256xf32, #tpu.memory_space<vmem>>, vector<16x128xf32>
    tpu.vector_store %arg9[%c0_20, %c0_21], %32 {strides = array<i32>} : memref<16x256xf32, #tpu.memory_space<vmem>>, vector<16x128xf32>,
    %34 = vector.extract_strided_slice %20 {offsets = [0, 128], sizes = [16, 128], strides = [1, 1]} : vector<16x256xf32> to vector<16x128xf32>
    %c0_22 = arith.constant 0 : index
    %c128 = arith.constant 128 : index
    %35 = vector.load %arg9[%c0_22, %c128] : memref<16x256xf32, #tpu.memory_space<vmem>>, vector<16x128xf32>
    tpu.vector_store %arg9[%c0_22, %c128], %34 {strides = array<i32>} : memref<16x256xf32, #tpu.memory_space<vmem>>, vector<16x128xf32>,
    return
  }
  func.func @transform_0(%arg0: i32) -> (i32, i32) {
    %c0_i32 = arith.constant 0 : i32
    %c0_i32_0 = arith.constant 0 : i32
    return %arg0, %c0_i32 : i32, i32
  }
  func.func @transform_1(%arg0: i32) -> (i32, i32) {
    %c0_i32 = arith.constant 0 : i32
    %c0_i32_0 = arith.constant 0 : i32
    %c0_i32_1 = arith.constant 0 : i32
    return %c0_i32, %c0_i32_0 : i32, i32
  }
  func.func @transform_2(%arg0: i32) -> (i32, i32) {
    %c0_i32 = arith.constant 0 : i32
    %c0_i32_0 = arith.constant 0 : i32
    %c0_i32_1 = arith.constant 0 : i32
    return %c0_i32, %c0_i32_0 : i32, i32
  }
  func.func @transform_3(%arg0: i32) -> (i32, i32) {
    %c0_i32 = arith.constant 0 : i32
    %c0_i32_0 = arith.constant 0 : i32
    %c0_i32_1 = arith.constant 0 : i32
    return %c0_i32, %c0_i32_0 : i32, i32
  }
  func.func @transform_4(%arg0: i32) -> (i32, i32) {
    %c0_i32 = arith.constant 0 : i32
    %c0_i32_0 = arith.constant 0 : i32
    %c0_i32_1 = arith.constant 0 : i32
    return %c0_i32, %c0_i32_0 : i32, i32
  }
  func.func @transform_5(%arg0: i32) -> (i32, i32) {
    %c0_i32 = arith.constant 0 : i32
    %c0_i32_0 = arith.constant 0 : i32
    %c0_i32_1 = arith.constant 0 : i32
    return %c0_i32, %c0_i32_0 : i32, i32
  }
  func.func @transform_6(%arg0: i32) -> (i32, i32) {
    %c0_i32 = arith.constant 0 : i32
    %c0_i32_0 = arith.constant 0 : i32
    %c0_i32_1 = arith.constant 0 : i32
    return %c0_i32, %c0_i32_0 : i32, i32
  }
  func.func @transform_7(%arg0: i32) -> (i32, i32) {
    %c0_i32 = arith.constant 0 : i32
    %c0_i32_0 = arith.constant 0 : i32
    %c0_i32_1 = arith.constant 0 : i32
    return %c0_i32, %c0_i32_0 : i32, i32
  }
  func.func @transform_8(%arg0: i32) -> (i32, i32) {
    %c0_i32 = arith.constant 0 : i32
    %c0_i32_0 = arith.constant 0 : i32
    return %arg0, %c0_i32 : i32, i32
  }
}

</mosaic_0001>

<bundles_post_ra>
// kernel: tpu_custom_call.1
= control target key start
LH: loop header
LB: loop body
LE: loop exit
PB: predicated region body
PF: predicated region fallthrough
CT: control target
= control target key end

     0   :  { %13 = vsyncpa [#allocation3], 0  ;;  %s970_s0 = inlined_call_operand.hbm [shape: bf16[16,128], index: 0, kind: input, shape index: {}]   ;;  %s971_s1 = inlined_call_operand.hbm [shape: bf16[128,128], index: 1, kind: input, shape index: {}]   ;;  %s972_s2 = inlined_call_operand.vmem [shape: f32[1,128], index: 2, kind: input, shape index: {}]   ;;  %s973_s3 = inlined_call_operand.hbm [shape: bf16[128,128], index: 3, kind: input, shape index: {}]   ;;  %s974_s4 = inlined_call_operand.vmem [shape: f32[1,128], index: 4, kind: input, shape index: {}]   ;;  %s975_s5 = inlined_call_operand.hbm [shape: bf16[128,256], index: 5, kind: input, shape index: {}]   ;;  %s976_s6 = inlined_call_operand.vmem [shape: f32[1,256], index: 6, kind: input, shape index: {}]   ;;  %s977_s7 = inlined_call_operand.vmem [shape: f32[1,128], index: 7, kind: input, shape index: {}]   ;;  %s978_s8 = inlined_call_operand.hbm [shape: f32[16,256], index: 8, kind: output, shape index: {}]  }
   0x1   :  { %14 = vsyncpa [#allocation6], 0 }
   0x2   :  { %15 = vsyncpa [#allocation9], 0 }
   0x3   :  { %16 = vsyncpa [#allocation4], 0  ;;  %s816_s27 = smov [#allocation5]   ;;  %s817_s29 = smov [#allocation2]  }
   0x4   :  { %s34_s28 = sshll.u32 %s816_s27, 4  ;;  %s22_s30 = sshll.u32 %s817_s29, 4  ;;  %s35_s28 = int_to_ptr.vmem [resolvable:$true] %s34_s28  ;;  %s875_s30 = int_to_ptr.vmem [resolvable:$true] %s22_s30 }
   0x5   :  { %s698_s11 = scalar_lea.hbm %s971_s1, 1024 }
   0x6   :  { %p699_p0 = scmp.ne.s32.totalorder %s971_s1, %s698_s11  ;;  %p702_p1 = scmp.lt.u32.totalorder %s698_s11, %s971_s1 }
   0x8   :  { %p704_p2 = pnand %p702_p1, %p699_p0 }
   0xa   :  { %707 = shalt.err (!%p704_p2)
}
   0xb   :  { %s708_s16 = scalar_lea.vmem %s35_s28, 1024  ;;  %p713_p4 = scmp.lt.s32.totalorder %s35_s28, %s35_s28 }
   0xc   :  { %p709_p3 = scmp.ne.s32.totalorder %s35_s28, %s708_s16  ;;  %p714_p5 = scmp.lt.s32.totalorder %s708_s16, %s708_s16 }
   0xe   :  { %p715_p6 = por %p714_p5, %p713_p4 }
  0x10   :  { %p716_p7 = pnand %p715_p6, %p709_p3 }
  0x12   :  { %719 = shalt.err (!%p716_p7)
}
  0x13   :  { %s818_s17 = smov 64   ;;  %s819_s18 = smov 4  }
  0x14   :  { %40 = dma.hbm_to_vmem [thread:$0]  %s971_s1, 1024, %s35_s28, [#allocation6], %s818_s17, %s818_s17, %s819_s18  }
  0x15   :  { %s720_s23 = scalar_lea.hbm %s970_s0, 128 }
  0x16   :  { %p721_p8 = scmp.ne.s32.totalorder %s970_s0, %s720_s23  ;;  %p724_p9 = scmp.lt.u32.totalorder %s720_s23, %s970_s0 }
  0x18   :  { %p726_p10 = pnand %p724_p9, %p721_p8 }
  0x1a   :  { %729 = shalt.err (!%p726_p10)
}
  0x1b   :  { %s730_s29 = scalar_lea.vmem %s875_s30, 128  ;;  %p735_p12 = scmp.lt.s32.totalorder %s875_s30, %s875_s30 }
  0x1c   :  { %p731_p11 = scmp.ne.s32.totalorder %s875_s30, %s730_s29  ;;  %p736_p13 = scmp.lt.s32.totalorder %s730_s29, %s730_s29 }
  0x1e   :  { %p737_p0 = por %p736_p13, %p735_p12 }
  0x20   :  { %p738_p1 = pnand %p737_p0, %p731_p11 }
  0x22   :  { %741 = shalt.err (!%p738_p1)
}
  0x23   :  { %28 = dma.hbm_to_vmem [thread:$0]  %s970_s0, 128, %s875_s30, [#allocation3], %s818_s17, %s818_s17, %s819_s18  }
  0x24   :  { %s820_s9 = smov [#allocation7]   ;;  %s821_s11 = smov [#allocation8]  }
  0x25   :  { %s48_s10 = sshll.u32 %s820_s9, 4  ;;  %s62_s12 = sshll.u32 %s821_s11, 4  ;;  %s49_s10 = int_to_ptr.vmem [resolvable:$true] %s48_s10  ;;  %s912_s12 = int_to_ptr.vmem [resolvable:$true] %s62_s12 }
  0x26   :  { %s742_s15 = scalar_lea.hbm %s973_s3, 1024 }
  0x27   :  { %p743_p2 = scmp.ne.s32.totalorder %s973_s3, %s742_s15  ;;  %p746_p3 = scmp.lt.u32.totalorder %s742_s15, %s973_s3 }
  0x29   :  { %p748_p4 = pnand %p746_p3, %p743_p2 }
  0x2b   :  { %751 = shalt.err (!%p748_p4)
}
  0x2c   :  { %s752_s0 = scalar_lea.vmem %s49_s10, 1024  ;;  %p757_p6 = scmp.lt.s32.totalorder %s49_s10, %s49_s10 }
  0x2d   :  { %p753_p5 = scmp.ne.s32.totalorder %s49_s10, %s752_s0  ;;  %p758_p7 = scmp.lt.s32.totalorder %s752_s0, %s752_s0 }
  0x2f   :  { %p759_p8 = por %p758_p7, %p757_p6 }
  0x31   :  { %p760_p9 = pnand %p759_p8, %p753_p5 }
  0x33   :  { %763 = shalt.err (!%p760_p9)
}
  0x34   :  { %54 = dma.hbm_to_vmem [thread:$0]  %s973_s3, 1024, %s49_s10, [#allocation6], %s818_s17, %s818_s17, %s819_s18  }
  0x35   :  { %s764_s25 = scalar_lea.hbm %s975_s5, 2048 }
  0x36   :  { %p765_p10 = scmp.ne.s32.totalorder %s975_s5, %s764_s25  ;;  %p768_p11 = scmp.lt.u32.totalorder %s764_s25, %s975_s5 }
  0x38   :  { %p770_p12 = pnand %p768_p11, %p765_p10 }
  0x3a   :  { %773 = shalt.err (!%p770_p12)
}
  0x3b   :  { %s774_s28 = scalar_lea.vmem %s912_s12, 2048  ;;  %p779_p0 = scmp.lt.s32.totalorder %s912_s12, %s912_s12 }
  0x3c   :  { %p775_p13 = scmp.ne.s32.totalorder %s912_s12, %s774_s28  ;;  %p780_p1 = scmp.lt.s32.totalorder %s774_s28, %s774_s28 }
  0x3e   :  { %p781_p2 = por %p780_p1, %p779_p0 }
  0x40   :  { %p782_p3 = pnand %p781_p2, %p775_p13 }
  0x42   :  { %785 = shalt.err (!%p782_p3)
}
  0x43   :  { %s822_s3 = smov 128   ;;  %s823_s17 = smov 8  }
  0x44   :  { %68 = dma.hbm_to_vmem [thread:$0]  %s975_s5, 2048, %s912_s12, [#allocation9], %s822_s3, %s822_s3, %s823_s17  }
  0x45   :  { %808 = dma.done.wait [#allocation3], 128  }
  0x46   :  { %809 = vsyncadd [#allocation3], 4294967168 }
  0x47   :  { %810 = dma.done.wait [#allocation6], 2048  }
  0x48   :  { %811 = vsyncadd [#allocation6], 4294965248 }
  0x49   :  { %812 = dma.done.wait [#allocation9], 2048  }
  0x4a   :  { %813 = vsyncadd [#allocation9], 4294965248  ;;  %v824_v0 = vmov 0.0   ;;  %vm825_vm0 = vmmov 0   ;;  %v645_v1 = vld [vmem:[#allocation5] sm:$0xff]   ;;  %v646_v2 = vld [vmem:[#allocation5 + $0x8] sm:$0xff]   ;;  %v342_v55 = vlaneseq }
  0x4b   :  { %591 = vmatprep.subr.bf16.mxu0 %v824_v0  ;;  %607 = vmatprep.mubr.msk.bf16.mxu0 %vm825_vm0, %v824_v0  ;;  %v647_v3 = vld [vmem:[#allocation5 + $0x10] sm:$0xff]   ;;  %v654_v4 = vld [vmem:[#allocation7] sm:$0xff]   ;;  %v648_v5 = vld [vmem:[#allocation5 + $0x18] sm:$0xff]   ;;  %v826_v42 = vmov 0   ;;  %s827_s14 = smov [#allocation10]  }
  0x4c   :  { %611 = vmatprep.subr.bf16.mxu1 %v824_v0  ;;  %627 = vmatprep.mubr.msk.bf16.mxu1 %vm825_vm0, %v824_v0  ;;  %v655_v6 = vld [vmem:[#allocation7 + $0x8] sm:$0xff]   ;;  %v649_v7 = vld [vmem:[#allocation5 + $0x20] sm:$0xff]   ;;  %v656_v8 = vld [vmem:[#allocation7 + $0x10] sm:$0xff]   ;;  %v343_v56 = vshrl.u32 %v342_v55, 7  ;;  %s523_s15 = sshll.u32 %s827_s14, 4  ;;  %s524_s15 = int_to_ptr.vmem [resolvable:$true] %s523_s15 }
  0x4d   :  { %592 = vmatpush3.bf16.msra.mxu0 %v645_v1  ;;  %612 = vmatpush3.bf16.msra.mxu1 %v654_v4  ;;  %v650_v9 = vld [vmem:[#allocation5 + $0x28] sm:$0xff]   ;;  %v657_v10 = vld [vmem:[#allocation7 + $0x18] sm:$0xff]   ;;  %v651_v11 = vld [vmem:[#allocation5 + $0x30] sm:$0xff]   ;;  %s786_s16 = scalar_lea.vmem %s524_s15, 512  ;;  %p791_p5 = scmp.lt.s32.totalorder %s524_s15, %s524_s15 }
  0x4e   :  { %593 = vmatprep.subr.bf16.mxu0 %v824_v0  ;;  %613 = vmatprep.subr.bf16.mxu1 %v824_v0  ;;  %v658_v12 = vld [vmem:[#allocation7 + $0x20] sm:$0xff]   ;;  %v652_v13 = vld [vmem:[#allocation5 + $0x38] sm:$0xff]   ;;  %v659_v14 = vld [vmem:[#allocation7 + $0x28] sm:$0xff]   ;;  %v344_v57 = vsub.s32 0, %v343_v56  ;;  %v348_v59 = vsub.s32 1, %v343_v56  ;;  %p787_p4 = scmp.ne.s32.totalorder %s524_s15, %s786_s16  ;;  %p792_p6 = scmp.lt.s32.totalorder %s786_s16, %s786_s16 }
  0x4f   :  { %v653_v15 = vld [vmem:[#allocation2] sm:$0xff]   ;;  %v660_v16 = vld [vmem:[#allocation7 + $0x30] sm:$0xff]   ;;  %v662_v18 = vld [vmem:[#allocation8] ss:$8 sps:$4 sm:$0xff]  }
  0x50   :  { %v661_v17 = vld [vmem:[#allocation7 + $0x38] sm:$0xff]   ;;  %v664_v19 = vld [vmem:[#allocation8 + $0x4] ss:$8 sps:$4 sm:$0xff]   ;;  %v668_v23 = vld [vmem:[#allocation8 + $0x20] ss:$8 sps:$4 sm:$0xff]   ;;  %p793_p7 = por %p792_p6, %p791_p5 }
  0x51   :  { %594 = vmatpush3.bf16.msra.mxu0 %v646_v2  ;;  %614 = vmatpush3.bf16.msra.mxu1 %v655_v6  ;;  %v667_v20 = vld [vmem:[#allocation8 + $0x14] ss:$8 sps:$4 sm:$0xff]   ;;  %v665_v21 = vld [vmem:[#allocation8 + $0x10] ss:$8 sps:$4 sm:$0xff]   ;;  %v670_v22 = vld [vmem:[#allocation8 + $0x24] ss:$8 sps:$4 sm:$0xff]  }
  0x52   :  { %595 = vmatprep.subr.bf16.mxu0 %v824_v0  ;;  %615 = vmatprep.subr.bf16.mxu1 %v824_v0  ;;  %v673_v24 = vld [vmem:[#allocation8 + $0x34] ss:$8 sps:$4 sm:$0xff]   ;;  %v671_v25 = vld [vmem:[#allocation8 + $0x30] ss:$8 sps:$4 sm:$0xff]   ;;  %v676_v36 = vld [vmem:[#allocation8 + $0x44] ss:$8 sps:$4 sm:$0xff]   ;;  %p794_p8 = pnand %p793_p7, %p787_p4 }
  0x53   :  { %v537_v26 = vld [vmem:[%s972_s2] ss:$0 sm:$0xff]  ;;  %v674_v37 = vld [vmem:[#allocation8 + $0x40] ss:$8 sps:$4 sm:$0xff]   ;;  %v679_v38 = vld [vmem:[#allocation8 + $0x54] ss:$8 sps:$4 sm:$0xff]  }
  0x54   :  { %v677_v39 = vld [vmem:[#allocation8 + $0x50] ss:$8 sps:$4 sm:$0xff]   ;;  %v682_v40 = vld [vmem:[#allocation8 + $0x64] ss:$8 sps:$4 sm:$0xff]   ;;  %v680_v41 = vld [vmem:[#allocation8 + $0x60] ss:$8 sps:$4 sm:$0xff]  }
  0x55   :  { %596 = vmatpush3.bf16.msra.mxu0 %v647_v3  ;;  %616 = vmatpush3.bf16.msra.mxu1 %v656_v8  ;;  %v685_v43 = vld [vmem:[#allocation8 + $0x74] ss:$8 sps:$4 sm:$0xff]   ;;  %v683_v44 = vld [vmem:[#allocation8 + $0x70] ss:$8 sps:$4 sm:$0xff]  }
  0x56   :  { %597 = vmatprep.subr.bf16.mxu0 %v824_v0  ;;  %617 = vmatprep.subr.bf16.mxu1 %v824_v0  ;;  %v547_v45 = vld [vmem:[%s974_s4] ss:$0 sm:$0xff] }
  0x57   :  { %v340_v58 = vld [vmem:[%s976_s6] sm:$0x3] }
  0x58   :  { %v345_v60 = vrot.slane %v340_v58, %v344_v57  ;;  %v349_v61 = vrot.slane %v340_v58, %v348_v59 }
  0x59   :  { %598 = vmatpush3.bf16.msra.mxu0 %v648_v5  ;;  %618 = vmatpush3.bf16.msra.mxu1 %v657_v10 }
  0x5a   :  { %599 = vmatprep.subr.bf16.mxu0 %v824_v0  ;;  %619 = vmatprep.subr.bf16.mxu1 %v824_v0 }
  0x5d   :  { %600 = vmatpush3.bf16.msra.mxu0 %v649_v7  ;;  %620 = vmatpush3.bf16.msra.mxu1 %v658_v12 }
  0x5e   :  { %601 = vmatprep.subr.bf16.mxu0 %v824_v0  ;;  %621 = vmatprep.subr.bf16.mxu1 %v824_v0 }
  0x61   :  { %602 = vmatpush3.bf16.msra.mxu0 %v650_v9  ;;  %622 = vmatpush3.bf16.msra.mxu1 %v659_v14 }
  0x62   :  { %603 = vmatprep.subr.bf16.mxu0 %v824_v0  ;;  %623 = vmatprep.subr.bf16.mxu1 %v824_v0 }
  0x65   :  { %604 = vmatpush3.bf16.msra.mxu0 %v651_v11  ;;  %624 = vmatpush3.bf16.msra.mxu1 %v660_v16 }
  0x66   :  { %605 = vmatprep.subr.bf16.mxu0 %v824_v0  ;;  %625 = vmatprep.subr.bf16.mxu1 %v824_v0 }
  0x69   :  { %606 = vmatpush3.bf16.msra.mxu0 %v652_v13  ;;  %626 = vmatpush3.bf16.msra.mxu1 %v661_v17 }
  0x6a   :  { %432 = vmatprep.subr.bf16.mxu0 %v664_v19 }
  0x6c   :  { %608 = vmatmul.mubr.bf16.vlgmr.msra.gmra.mrb[0].mxu0 %v653_v15 }
  0x6d   :  { %433 = vmatpush1.bf16.msra.mxu0 %v662_v18  ;;  %464 = vmatprep.mubr.bf16.mxu0 %v826_v42 }
  0x6e   :  { %434 = vmatprep.subr.bf16.mxu0 %v667_v20 }
  0x71   :  { %435 = vmatpush1.bf16.msra.mxu0 %v665_v21 }
  0x72   :  { %436 = vmatprep.subr.bf16.mxu0 %v670_v22 }
  0x75   :  { %437 = vmatpush1.bf16.msra.mxu0 %v668_v23 }
  0x76   :  { %438 = vmatprep.subr.bf16.mxu0 %v673_v24 }
  0x79   :  { %439 = vmatpush1.bf16.msra.mxu0 %v671_v25 }
  0x7a   :  { %440 = vmatprep.subr.bf16.mxu0 %v676_v36 }
  0x7d   :  { %441 = vmatpush1.bf16.msra.mxu0 %v674_v37 }
  0x7e   :  { %442 = vmatprep.subr.bf16.mxu0 %v679_v38 }
  0x81   :  { %443 = vmatpush1.bf16.msra.mxu0 %v677_v39 }
  0x82   :  { %444 = vmatprep.subr.bf16.mxu0 %v682_v40 }
  0x85   :  { %445 = vmatpush1.bf16.msra.mxu0 %v680_v41 }
  0x86   :  { %446 = vmatprep.subr.bf16.mxu0 %v685_v43 }
  0x89   :  { %447 = vmatpush1.bf16.msra.mxu0 %v683_v44 }
 0x13f   :  { %v199_v27 = vpop.f32.mrb[0].mxu0 }
 0x140   :  { %v200_v28 = vadd.f32 %v537_v26, %v199_v27  ;;  %v609_v29 = vpop.f32.mrb[1].mxu0 }
 0x141   :  { %v202_v30 = vpop.f32.mrb[2].mxu0 }
 0x142   :  { %v203_v31 = vadd.f32 %v537_v26, %v202_v30  ;;  %v610_v32 = vpop.f32.mrb[3].mxu0  ;;  %v206_v33 = vmax.f32 %v200_v28, 0.0  ;;  %v572_v28 = vld [vmem:[%s977_s7] ss:$0 sm:$0xff] }
 0x144   :  { %v207_v34 = vmax.f32 %v203_v31, 0.0 }
 0x146   :  { %v208_v35 = vpack.c.bf16 %v207_v34, %v206_v33 }
 0x148   :  { %628 = vmatmul.mubr.bf16.vlgmr.msra.gmra.mrb[0].mxu1 %v208_v35 }
 0x21b   :  { %v314_v46 = vpop.f32.mrb[0].mxu1 }
 0x21c   :  { %v315_v47 = vadd.f32 %v547_v45, %v314_v46  ;;  %v629_v48 = vpop.f32.mrb[1].mxu1 }
 0x21d   :  { %v317_v49 = vpop.f32.mrb[2].mxu1 }
 0x21e   :  { %v318_v50 = vadd.f32 %v547_v45, %v317_v49  ;;  %v630_v51 = vpop.f32.mrb[3].mxu1  ;;  %686 = vtanh.f32 %v315_v47 }
 0x220   :  { %688 = vtanh.f32 %v318_v50 }
 0x228   :  { %v687_v52 = vpop.eup %686 }
 0x22a   :  { %v689_v53 = vpop.eup %688 }
 0x22b   :  { %v323_v54 = vpack.c.bf16 %v689_v53, %v687_v52 }
 0x22d   :  { %465 = vmatmul.mubr.bf16.vlgmr.msra.gmra.mrb[4].mxu0 %v323_v54 }
 0x300   :  { %v466_v62 = vpop.f32.mrb[4].mxu0 }
 0x301   :  { %v467_v63 = vadd.f32 %v466_v62, %v345_v60  ;;  %v468_v0 = vpop.f32.mrb[5].mxu0 }
 0x302   :  { %v469_v1 = vadd.f32 %v468_v0, %v349_v61  ;;  %v470_v2 = vpop.f32.mrb[6].mxu0 }
 0x303   :  { %v477_v3 = vand.u32 2147483647, %v467_v63  ;;  %v471_v4 = vadd.f32 %v470_v2, %v345_v60  ;;  %v472_v5 = vpop.f32.mrb[7].mxu0  ;;  %v475_v26 = vmax.f32 %v467_v63, 0.0 }
 0x304   :  { %516 = vst [vmem:[#allocation10 + $0x8] sm:$0xff] %v469_v1  ;;  %v473_v6 = vadd.f32 %v472_v5, %v349_v61 }
 0x305   :  { %v479_v7 = vsub.f32 0.0, %v477_v3  ;;  %v478_v8 = vand.u32 2147483647, %v471_v4  ;;  %v476_v32 = vmax.f32 %v471_v4, 0.0 }
 0x306   :  { %517 = vst [vmem:[#allocation10 + $0x18] sm:$0xff] %v473_v6 }
 0x307   :  { %v481_v9 = vmul.f32 1.442695, %v479_v7  ;;  %v480_v10 = vsub.f32 0.0, %v478_v8 }
 0x309   :  { %690 = vpow2.f32 %v481_v9  ;;  %v483_v11 = vmul.f32 1.442695, %v480_v10 }
 0x30b   :  { %692 = vpow2.f32 %v483_v11 }
 0x313   :  { %v691_v12 = vpop.eup %690 }
 0x314   :  { %v485_v13 = vadd.f32 1.0, %v691_v12  ;;  %v488_v16 = vmul.f32 -0.5, %v691_v12  ;;  %v491_v19 = vand.u32 2147483647, %v691_v12 }
 0x315   :  { %v693_v14 = vpop.eup %692 }
 0x316   :  { %694 = vlog2.f32 %v485_v13  ;;  %v494_v15 = vadd.f32 1.0, %v693_v14  ;;  %v497_v17 = vmul.f32 -0.5, %v693_v14  ;;  %v489_v18 = vadd.f32 1.0, %v488_v16 }
 0x317   :  { %v500_v22 = vand.u32 2147483647, %v693_v14  ;;  %vm492_vm1 = vcmp.lt.f32.partialorder %v491_v19, 0.0004427343 }
 0x318   :  { %696 = vlog2.f32 %v494_v15  ;;  %v498_v20 = vadd.f32 1.0, %v497_v17  ;;  %v490_v24 = vmul.f32 %v691_v12, %v489_v18 }
 0x319   :  { %vm501_vm2 = vcmp.lt.f32.partialorder %v500_v22, 0.0004427343 }
 0x31a   :  { %v499_v30 = vmul.f32 %v693_v14, %v498_v20 }
 0x320   :  { %v695_v21 = vpop.eup %694 }
 0x321   :  { %v487_v23 = vmul.f32 0.6931472, %v695_v21 }
 0x322   :  { %v697_v25 = vpop.eup %696 }
 0x323   :  { %v493_v27 = vsel %vm492_vm1, %v490_v24, %v487_v23  ;;  %v496_v29 = vmul.f32 0.6931472, %v697_v25 }
 0x324   :  { %v503_v31 = vadd.f32 %v493_v27, %v475_v26 }
 0x325   :  { %v502_v33 = vsel %vm501_vm2, %v499_v30, %v496_v29 }
 0x326   :  { %v512_v34 = vmul.f32 %v572_v28, %v503_v31  ;;  %v504_v35 = vadd.f32 %v502_v33, %v476_v32 }
 0x328   :  { %514 = vst [vmem:[#allocation10] sm:$0xff] %v512_v34  ;;  %v513_v36 = vmul.f32 %v572_v28, %v504_v35 }
 0x32a   :  { %515 = vst [vmem:[#allocation10 + $0x10] sm:$0xff] %v513_v36 }
 0x32b   :  { %797 = shalt.err (!%p794_p8)
}
 0x32c   :  { %s798_s20 = scalar_lea.hbm %s978_s8, 512 }
 0x32d   :  { %p799_p9 = scmp.ne.s32.totalorder %s978_s8, %s798_s20  ;;  %p802_p10 = scmp.lt.u32.totalorder %s798_s20, %s978_s8 }
 0x32f   :  { %p804_p11 = pnand %p802_p10, %p799_p9 }
 0x331   :  { %807 = shalt.err (!%p804_p11)
}
 0x332   :  { %s828_s23 = smov 256   ;;  %s829_s24 = smov 16  }
 0x333   :  { %529 = dma.vmem_to_hbm [thread:$0]  %s524_s15, 512, %s978_s8, [#allocation4], %s828_s23, %s828_s23, %s829_s24  }
 0x334   :  { %814 = dma.done.wait [#allocation4], 512  }
 0x335   :  { %815 = vsyncadd [#allocation4], 4294966784 }
 0x336   :  { %533 = vsyncpa [#allocation3], 1 }
 0x337   :  { %534 = vsyncpa [#allocation6], 1 }
 0x338   :  { %535 = vsyncpa [#allocation9], 1 }
 0x339   :  { %536 = vsyncpa [#allocation4], 1 }

// kernel: tpu_custom_call.1
= control target key start
LH: loop header
LB: loop body
LE: loop exit
PB: predicated region body
PF: predicated region fallthrough
CT: control target
= control target key end

     0   :  { %13 = vsyncpa [#allocation3], 0  ;;  %s970_s0 = inlined_call_operand.hbm [shape: bf16[16,128], index: 0, kind: input, shape index: {}]   ;;  %s971_s1 = inlined_call_operand.hbm [shape: bf16[128,128], index: 1, kind: input, shape index: {}]   ;;  %s972_s2 = inlined_call_operand.vmem [shape: f32[1,128], index: 2, kind: input, shape index: {}]   ;;  %s973_s3 = inlined_call_operand.hbm [shape: bf16[128,128], index: 3, kind: input, shape index: {}]   ;;  %s974_s4 = inlined_call_operand.vmem [shape: f32[1,128], index: 4, kind: input, shape index: {}]   ;;  %s975_s5 = inlined_call_operand.hbm [shape: bf16[128,256], index: 5, kind: input, shape index: {}]   ;;  %s976_s6 = inlined_call_operand.vmem [shape: f32[1,256], index: 6, kind: input, shape index: {}]   ;;  %s977_s7 = inlined_call_operand.vmem [shape: f32[1,128], index: 7, kind: input, shape index: {}]   ;;  %s978_s8 = inlined_call_operand.hbm [shape: f32[16,256], index: 8, kind: output, shape index: {}]  }
   0x1   :  { %14 = vsyncpa [#allocation6], 0 }
   0x2   :  { %15 = vsyncpa [#allocation9], 0 }
   0x3   :  { %16 = vsyncpa [#allocation4], 0  ;;  %s816_s27 = smov [#allocation5]   ;;  %s817_s29 = smov [#allocation2]  }
   0x4   :  { %s34_s28 = sshll.u32 %s816_s27, 4  ;;  %s22_s30 = sshll.u32 %s817_s29, 4  ;;  %s35_s28 = int_to_ptr.vmem [resolvable:$true] %s34_s28  ;;  %s875_s30 = int_to_ptr.vmem [resolvable:$true] %s22_s30 }
   0x5   :  { %s698_s11 = scalar_lea.hbm %s971_s1, 1024 }
   0x6   :  { %p699_p0 = scmp.ne.s32.totalorder %s971_s1, %s698_s11  ;;  %p702_p1 = scmp.lt.u32.totalorder %s698_s11, %s971_s1 }
   0x8   :  { %p704_p2 = pnand %p702_p1, %p699_p0 }
   0xa   :  { %707 = shalt.err (!%p704_p2)
}
   0xb   :  { %s708_s16 = scalar_lea.vmem %s35_s28, 1024  ;;  %p713_p4 = scmp.lt.s32.totalorder %s35_s28, %s35_s28 }
   0xc   :  { %p709_p3 = scmp.ne.s32.totalorder %s35_s28, %s708_s16  ;;  %p714_p5 = scmp.lt.s32.totalorder %s708_s16, %s708_s16 }
   0xe   :  { %p715_p6 = por %p714_p5, %p713_p4 }
  0x10   :  { %p716_p7 = pnand %p715_p6, %p709_p3 }
  0x12   :  { %719 = shalt.err (!%p716_p7)
}
  0x13   :  { %s818_s17 = smov 64   ;;  %s819_s18 = smov 4  }
  0x14   :  { %40 = dma.hbm_to_vmem [thread:$0]  %s971_s1, 1024, %s35_s28, [#allocation6], %s818_s17, %s818_s17, %s819_s18  }
  0x15   :  { %s720_s23 = scalar_lea.hbm %s970_s0, 128 }
  0x16   :  { %p721_p8 = scmp.ne.s32.totalorder %s970_s0, %s720_s23  ;;  %p724_p9 = scmp.lt.u32.totalorder %s720_s23, %s970_s0 }
  0x18   :  { %p726_p10 = pnand %p724_p9, %p721_p8 }
  0x1a   :  { %729 = shalt.err (!%p726_p10)
}
  0x1b   :  { %s730_s29 = scalar_lea.vmem %s875_s30, 128  ;;  %p735_p12 = scmp.lt.s32.totalorder %s875_s30, %s875_s30 }
  0x1c   :  { %p731_p11 = scmp.ne.s32.totalorder %s875_s30, %s730_s29  ;;  %p736_p13 = scmp.lt.s32.totalorder %s730_s29, %s730_s29 }
  0x1e   :  { %p737_p0 = por %p736_p13, %p735_p12 }
  0x20   :  { %p738_p1 = pnand %p737_p0, %p731_p11 }
  0x22   :  { %741 = shalt.err (!%p738_p1)
}
  0x23   :  { %28 = dma.hbm_to_vmem [thread:$0]  %s970_s0, 128, %s875_s30, [#allocation3], %s818_s17, %s818_s17, %s819_s18  }
  0x24   :  { %s820_s9 = smov [#allocation7]   ;;  %s821_s11 = smov [#allocation8]  }
  0x25   :  { %s48_s10 = sshll.u32 %s820_s9, 4  ;;  %s62_s12 = sshll.u32 %s821_s11, 4  ;;  %s49_s10 = int_to_ptr.vmem [resolvable:$true] %s48_s10  ;;  %s912_s12 = int_to_ptr.vmem [resolvable:$true] %s62_s12 }
  0x26   :  { %s742_s15 = scalar_lea.hbm %s973_s3, 1024 }
  0x27   :  { %p743_p2 = scmp.ne.s32.totalorder %s973_s3, %s742_s15  ;;  %p746_p3 = scmp.lt.u32.totalorder %s742_s15, %s973_s3 }
  0x29   :  { %p748_p4 = pnand %p746_p3, %p743_p2 }
  0x2b   :  { %751 = shalt.err (!%p748_p4)
}
  0x2c   :  { %s752_s0 = scalar_lea.vmem %s49_s10, 1024  ;;  %p757_p6 = scmp.lt.s32.totalorder %s49_s10, %s49_s10 }
  0x2d   :  { %p753_p5 = scmp.ne.s32.totalorder %s49_s10, %s752_s0  ;;  %p758_p7 = scmp.lt.s32.totalorder %s752_s0, %s752_s0 }
  0x2f   :  { %p759_p8 = por %p758_p7, %p757_p6 }
  0x31   :  { %p760_p9 = pnand %p759_p8, %p753_p5 }
  0x33   :  { %763 = shalt.err (!%p760_p9)
}
  0x34   :  { %54 = dma.hbm_to_vmem [thread:$0]  %s973_s3, 1024, %s49_s10, [#allocation6], %s818_s17, %s818_s17, %s819_s18  }
  0x35   :  { %s764_s25 = scalar_lea.hbm %s975_s5, 2048 }
  0x36   :  { %p765_p10 = scmp.ne.s32.totalorder %s975_s5, %s764_s25  ;;  %p768_p11 = scmp.lt.u32.totalorder %s764_s25, %s975_s5 }
  0x38   :  { %p770_p12 = pnand %p768_p11, %p765_p10 }
  0x3a   :  { %773 = shalt.err (!%p770_p12)
}
  0x3b   :  { %s774_s28 = scalar_lea.vmem %s912_s12, 2048  ;;  %p779_p0 = scmp.lt.s32.totalorder %s912_s12, %s912_s12 }
  0x3c   :  { %p775_p13 = scmp.ne.s32.totalorder %s912_s12, %s774_s28  ;;  %p780_p1 = scmp.lt.s32.totalorder %s774_s28, %s774_s28 }
  0x3e   :  { %p781_p2 = por %p780_p1, %p779_p0 }
  0x40   :  { %p782_p3 = pnand %p781_p2, %p775_p13 }
  0x42   :  { %785 = shalt.err (!%p782_p3)
}
  0x43   :  { %s822_s3 = smov 128   ;;  %s823_s17 = smov 8  }
  0x44   :  { %68 = dma.hbm_to_vmem [thread:$0]  %s975_s5, 2048, %s912_s12, [#allocation9], %s822_s3, %s822_s3, %s823_s17  }
  0x45   :  { %808 = dma.done.wait [#allocation3], 128  }
  0x46   :  { %809 = vsyncadd [#allocation3], 4294967168 }
  0x47   :  { %810 = dma.done.wait [#allocation6], 2048  }
  0x48   :  { %811 = vsyncadd [#allocation6], 4294965248 }
  0x49   :  { %812 = dma.done.wait [#allocation9], 2048  }
  0x4a   :  { %813 = vsyncadd [#allocation9], 4294965248  ;;  %v824_v0 = vmov 0.0   ;;  %vm825_vm0 = vmmov 0   ;;  %v645_v1 = vld [vmem:[#allocation5] sm:$0xff]   ;;  %v646_v2 = vld [vmem:[#allocation5 + $0x8] sm:$0xff]   ;;  %v342_v55 = vlaneseq }
  0x4b   :  { %591 = vmatprep.subr.bf16.mxu0 %v824_v0  ;;  %607 = vmatprep.mubr.msk.bf16.mxu0 %vm825_vm0, %v824_v0  ;;  %v647_v3 = vld [vmem:[#allocation5 + $0x10] sm:$0xff]   ;;  %v654_v4 = vld [vmem:[#allocation7] sm:$0xff]   ;;  %v648_v5 = vld [vmem:[#allocation5 + $0x18] sm:$0xff]   ;;  %v826_v42 = vmov 0   ;;  %s827_s14 = smov [#allocation10]  }
  0x4c   :  { %611 = vmatprep.subr.bf16.mxu1 %v824_v0  ;;  %627 = vmatprep.mubr.msk.bf16.mxu1 %vm825_vm0, %v824_v0  ;;  %v655_v6 = vld [vmem:[#allocation7 + $0x8] sm:$0xff]   ;;  %v649_v7 = vld [vmem:[#allocation5 + $0x20] sm:$0xff]   ;;  %v656_v8 = vld [vmem:[#allocation7 + $0x10] sm:$0xff]   ;;  %v343_v56 = vshrl.u32 %v342_v55, 7  ;;  %s523_s15 = sshll.u32 %s827_s14, 4  ;;  %s524_s15 = int_to_ptr.vmem [resolvable:$true] %s523_s15 }
  0x4d   :  { %592 = vmatpush3.bf16.msra.mxu0 %v645_v1  ;;  %612 = vmatpush3.bf16.msra.mxu1 %v654_v4  ;;  %v650_v9 = vld [vmem:[#allocation5 + $0x28] sm:$0xff]   ;;  %v657_v10 = vld [vmem:[#allocation7 + $0x18] sm:$0xff]   ;;  %v651_v11 = vld [vmem:[#allocation5 + $0x30] sm:$0xff]   ;;  %s786_s16 = scalar_lea.vmem %s524_s15, 512  ;;  %p791_p5 = scmp.lt.s32.totalorder %s524_s15, %s524_s15 }
  0x4e   :  { %593 = vmatprep.subr.bf16.mxu0 %v824_v0  ;;  %613 = vmatprep.subr.bf16.mxu1 %v824_v0  ;;  %v658_v12 = vld [vmem:[#allocation7 + $0x20] sm:$0xff]   ;;  %v652_v13 = vld [vmem:[#allocation5 + $0x38] sm:$0xff]   ;;  %v659_v14 = vld [vmem:[#allocation7 + $0x28] sm:$0xff]   ;;  %v344_v57 = vsub.s32 0, %v343_v56  ;;  %v348_v59 = vsub.s32 1, %v343_v56  ;;  %p787_p4 = scmp.ne.s32.totalorder %s524_s15, %s786_s16  ;;  %p792_p6 = scmp.lt.s32.totalorder %s786_s16, %s786_s16 }
  0x4f   :  { %v653_v15 = vld [vmem:[#allocation2] sm:$0xff]   ;;  %v660_v16 = vld [vmem:[#allocation7 + $0x30] sm:$0xff]   ;;  %v662_v18 = vld [vmem:[#allocation8] ss:$8 sps:$4 sm:$0xff]  }
  0x50   :  { %v661_v17 = vld [vmem:[#allocation7 + $0x38] sm:$0xff]   ;;  %v664_v19 = vld [vmem:[#allocation8 + $0x4] ss:$8 sps:$4 sm:$0xff]   ;;  %v668_v23 = vld [vmem:[#allocation8 + $0x20] ss:$8 sps:$4 sm:$0xff]   ;;  %p793_p7 = por %p792_p6, %p791_p5 }
  0x51   :  { %594 = vmatpush3.bf16.msra.mxu0 %v646_v2  ;;  %614 = vmatpush3.bf16.msra.mxu1 %v655_v6  ;;  %v667_v20 = vld [vmem:[#allocation8 + $0x14] ss:$8 sps:$4 sm:$0xff]   ;;  %v665_v21 = vld [vmem:[#allocation8 + $0x10] ss:$8 sps:$4 sm:$0xff]   ;;  %v670_v22 = vld [vmem:[#allocation8 + $0x24] ss:$8 sps:$4 sm:$0xff]  }
  0x52   :  { %595 = vmatprep.subr.bf16.mxu0 %v824_v0  ;;  %615 = vmatprep.subr.bf16.mxu1 %v824_v0  ;;  %v673_v24 = vld [vmem:[#allocation8 + $0x34] ss:$8 sps:$4 sm:$0xff]   ;;  %v671_v25 = vld [vmem:[#allocation8 + $0x30] ss:$8 sps:$4 sm:$0xff]   ;;  %v676_v36 = vld [vmem:[#allocation8 + $0x44] ss:$8 sps:$4 sm:$0xff]   ;;  %p794_p8 = pnand %p793_p7, %p787_p4 }
  0x53   :  { %v537_v26 = vld [vmem:[%s972_s2] ss:$0 sm:$0xff]  ;;  %v674_v37 = vld [vmem:[#allocation8 + $0x40] ss:$8 sps:$4 sm:$0xff]   ;;  %v679_v38 = vld [vmem:[#allocation8 + $0x54] ss:$8 sps:$4 sm:$0xff]  }
  0x54   :  { %v677_v39 = vld [vmem:[#allocation8 + $0x50] ss:$8 sps:$4 sm:$0xff]   ;;  %v682_v40 = vld [vmem:[#allocation8 + $0x64] ss:$8 sps:$4 sm:$0xff]   ;;  %v680_v41 = vld [vmem:[#allocation8 + $0x60] ss:$8 sps:$4 sm:$0xff]  }
  0x55   :  { %596 = vmatpush3.bf16.msra.mxu0 %v647_v3  ;;  %616 = vmatpush3.bf16.msra.mxu1 %v656_v8  ;;  %v685_v43 = vld [vmem:[#allocation8 + $0x74] ss:$8 sps:$4 sm:$0xff]   ;;  %v683_v44 = vld [vmem:[#allocation8 + $0x70] ss:$8 sps:$4 sm:$0xff]  }
  0x56   :  { %597 = vmatprep.subr.bf16.mxu0 %v824_v0  ;;  %617 = vmatprep.subr.bf16.mxu1 %v824_v0  ;;  %v547_v45 = vld [vmem:[%s974_s4] ss:$0 sm:$0xff] }
  0x57   :  { %v340_v58 = vld [vmem:[%s976_s6] sm:$0x3] }
  0x58   :  { %v345_v60 = vrot.slane %v340_v58, %v344_v57  ;;  %v349_v61 = vrot.slane %v340_v58, %v348_v59 }
  0x59   :  { %598 = vmatpush3.bf16.msra.mxu0 %v648_v5  ;;  %618 = vmatpush3.bf16.msra.mxu1 %v657_v10 }
  0x5a   :  { %599 = vmatprep.subr.bf16.mxu0 %v824_v0  ;;  %619 = vmatprep.subr.bf16.mxu1 %v824_v0 }
  0x5d   :  { %600 = vmatpush3.bf16.msra.mxu0 %v649_v7  ;;  %620 = vmatpush3.bf16.msra.mxu1 %v658_v12 }
  0x5e   :  { %601 = vmatprep.subr.bf16.mxu0 %v824_v0  ;;  %621 = vmatprep.subr.bf16.mxu1 %v824_v0 }
  0x61   :  { %602 = vmatpush3.bf16.msra.mxu0 %v650_v9  ;;  %622 = vmatpush3.bf16.msra.mxu1 %v659_v14 }
  0x62   :  { %603 = vmatprep.subr.bf16.mxu0 %v824_v0  ;;  %623 = vmatprep.subr.bf16.mxu1 %v824_v0 }
  0x65   :  { %604 = vmatpush3.bf16.msra.mxu0 %v651_v11  ;;  %624 = vmatpush3.bf16.msra.mxu1 %v660_v16 }
  0x66   :  { %605 = vmatprep.subr.bf16.mxu0 %v824_v0  ;;  %625 = vmatprep.subr.bf16.mxu1 %v824_v0 }
  0x69   :  { %606 = vmatpush3.bf16.msra.mxu0 %v652_v13  ;;  %626 = vmatpush3.bf16.msra.mxu1 %v661_v17 }
  0x6a   :  { %432 = vmatprep.subr.bf16.mxu0 %v664_v19 }
  0x6c   :  { %608 = vmatmul.mubr.bf16.vlgmr.msra.gmra.mrb[0].mxu0 %v653_v15 }
  0x6d   :  { %433 = vmatpush1.bf16.msra.mxu0 %v662_v18  ;;  %464 = vmatprep.mubr.bf16.mxu0 %v826_v42 }
  0x6e   :  { %434 = vmatprep.subr.bf16.mxu0 %v667_v20 }
  0x71   :  { %435 = vmatpush1.bf16.msra.mxu0 %v665_v21 }
  0x72   :  { %436 = vmatprep.subr.bf16.mxu0 %v670_v22 }
  0x75   :  { %437 = vmatpush1.bf16.msra.mxu0 %v668_v23 }
  0x76   :  { %438 = vmatprep.subr.bf16.mxu0 %v673_v24 }
  0x79   :  { %439 = vmatpush1.bf16.msra.mxu0 %v671_v25 }
  0x7a   :  { %440 = vmatprep.subr.bf16.mxu0 %v676_v36 }
  0x7d   :  { %441 = vmatpush1.bf16.msra.mxu0 %v674_v37 }
  0x7e   :  { %442 = vmatprep.subr.bf16.mxu0 %v679_v38 }
  0x81   :  { %443 = vmatpush1.bf16.msra.mxu0 %v677_v39 }
  0x82   :  { %444 = vmatprep.subr.bf16.mxu0 %v682_v40 }
  0x85   :  { %445 = vmatpush1.bf16.msra.mxu0 %v680_v41 }
  0x86   :  { %446 = vmatprep.subr.bf16.mxu0 %v685_v43 }
  0x89   :  { %447 = vmatpush1.bf16.msra.mxu0 %v683_v44 }
 0x13f   :  { %v199_v27 = vpop.f32.mrb[0].mxu0 }
 0x140   :  { %v200_v28 = vadd.f32 %v537_v26, %v199_v27  ;;  %v609_v29 = vpop.f32.mrb[1].mxu0 }
 0x141   :  { %v202_v30 = vpop.f32.mrb[2].mxu0 }
 0x142   :  { %v203_v31 = vadd.f32 %v537_v26, %v202_v30  ;;  %v610_v32 = vpop.f32.mrb[3].mxu0  ;;  %v206_v33 = vmax.f32 %v200_v28, 0.0  ;;  %v572_v28 = vld [vmem:[%s977_s7] ss:$0 sm:$0xff] }
 0x144   :  { %v207_v34 = vmax.f32 %v203_v31, 0.0 }
 0x146   :  { %v208_v35 = vpack.c.bf16 %v207_v34, %v206_v33 }
 0x148   :  { %628 = vmatmul.mubr.bf16.vlgmr.msra.gmra.mrb[0].mxu1 %v208_v35 }
 0x21b   :  { %v314_v46 = vpop.f32.mrb[0].mxu1 }
 0x21c   :  { %v315_v47 = vadd.f32 %v547_v45, %v314_v46  ;;  %v629_v48 = vpop.f32.mrb[1].mxu1 }
 0x21d   :  { %v317_v49 = vpop.f32.mrb[2].mxu1 }
 0x21e   :  { %v318_v50 = vadd.f32 %v547_v45, %v317_v49  ;;  %v630_v51 = vpop.f32.mrb[3].mxu1  ;;  %686 = vtanh.f32 %v315_v47 }
 0x220   :  { %688 = vtanh.f32 %v318_v50 }
 0x228   :  { %v687_v52 = vpop.eup %686 }
 0x22a   :  { %v689_v53 = vpop.eup %688 }
 0x22b   :  { %v323_v54 = vpack.c.bf16 %v689_v53, %v687_v52 }
 0x22d   :  { %465 = vmatmul.mubr.bf16.vlgmr.msra.gmra.mrb[4].mxu0 %v323_v54 }
 0x300   :  { %v466_v62 = vpop.f32.mrb[4].mxu0 }
 0x301   :  { %v467_v63 = vadd.f32 %v466_v62, %v345_v60  ;;  %v468_v0 = vpop.f32.mrb[5].mxu0 }
 0x302   :  { %v469_v1 = vadd.f32 %v468_v0, %v349_v61  ;;  %v470_v2 = vpop.f32.mrb[6].mxu0 }
 0x303   :  { %v477_v3 = vand.u32 2147483647, %v467_v63  ;;  %v471_v4 = vadd.f32 %v470_v2, %v345_v60  ;;  %v472_v5 = vpop.f32.mrb[7].mxu0  ;;  %v475_v26 = vmax.f32 %v467_v63, 0.0 }
 0x304   :  { %516 = vst [vmem:[#allocation10 + $0x8] sm:$0xff] %v469_v1  ;;  %v473_v6 = vadd.f32 %v472_v5, %v349_v61 }
 0x305   :  { %v479_v7 = vsub.f32 0.0, %v477_v3  ;;  %v478_v8 = vand.u32 2147483647, %v471_v4  ;;  %v476_v32 = vmax.f32 %v471_v4, 0.0 }
 0x306   :  { %517 = vst [vmem:[#allocation10 + $0x18] sm:$0xff] %v473_v6 }
 0x307   :  { %v481_v9 = vmul.f32 1.442695, %v479_v7  ;;  %v480_v10 = vsub.f32 0.0, %v478_v8 }
 0x309   :  { %690 = vpow2.f32 %v481_v9  ;;  %v483_v11 = vmul.f32 1.442695, %v480_v10 }
 0x30b   :  { %692 = vpow2.f32 %v483_v11 }
 0x313   :  { %v691_v12 = vpop.eup %690 }
 0x314   :  { %v485_v13 = vadd.f32 1.0, %v691_v12  ;;  %v488_v16 = vmul.f32 -0.5, %v691_v12  ;;  %v491_v19 = vand.u32 2147483647, %v691_v12 }
 0x315   :  { %v693_v14 = vpop.eup %692 }
 0x316   :  { %694 = vlog2.f32 %v485_v13  ;;  %v494_v15 = vadd.f32 1.0, %v693_v14  ;;  %v497_v17 = vmul.f32 -0.5, %v693_v14  ;;  %v489_v18 = vadd.f32 1.0, %v488_v16 }
 0x317   :  { %v500_v22 = vand.u32 2147483647, %v693_v14  ;;  %vm492_vm1 = vcmp.lt.f32.partialorder %v491_v19, 0.0004427343 }
 0x318   :  { %696 = vlog2.f32 %v494_v15  ;;  %v498_v20 = vadd.f32 1.0, %v497_v17  ;;  %v490_v24 = vmul.f32 %v691_v12, %v489_v18 }
 0x319   :  { %vm501_vm2 = vcmp.lt.f32.partialorder %v500_v22, 0.0004427343 }
 0x31a   :  { %v499_v30 = vmul.f32 %v693_v14, %v498_v20 }
 0x320   :  { %v695_v21 = vpop.eup %694 }
 0x321   :  { %v487_v23 = vmul.f32 0.6931472, %v695_v21 }
 0x322   :  { %v697_v25 = vpop.eup %696 }
 0x323   :  { %v493_v27 = vsel %vm492_vm1, %v490_v24, %v487_v23  ;;  %v496_v29 = vmul.f32 0.6931472, %v697_v25 }
 0x324   :  { %v503_v31 = vadd.f32 %v493_v27, %v475_v26 }
 0x325   :  { %v502_v33 = vsel %vm501_vm2, %v499_v30, %v496_v29 }
 0x326   :  { %v512_v34 = vmul.f32 %v572_v28, %v503_v31  ;;  %v504_v35 = vadd.f32 %v502_v33, %v476_v32 }
 0x328   :  { %514 = vst [vmem:[#allocation10] sm:$0xff] %v512_v34  ;;  %v513_v36 = vmul.f32 %v572_v28, %v504_v35 }
 0x32a   :  { %515 = vst [vmem:[#allocation10 + $0x10] sm:$0xff] %v513_v36 }
 0x32b   :  { %797 = shalt.err (!%p794_p8)
}
 0x32c   :  { %s798_s20 = scalar_lea.hbm %s978_s8, 512 }
 0x32d   :  { %p799_p9 = scmp.ne.s32.totalorder %s978_s8, %s798_s20  ;;  %p802_p10 = scmp.lt.u32.totalorder %s798_s20, %s978_s8 }
 0x32f   :  { %p804_p11 = pnand %p802_p10, %p799_p9 }
 0x331   :  { %807 = shalt.err (!%p804_p11)
}
 0x332   :  { %s828_s23 = smov 256   ;;  %s829_s24 = smov 16  }
 0x333   :  { %529 = dma.vmem_to_hbm [thread:$0]  %s524_s15, 512, %s978_s8, [#allocation4], %s828_s23, %s828_s23, %s829_s24  }
 0x334   :  { %814 = dma.done.wait [#allocation4], 512  }
 0x335   :  { %815 = vsyncadd [#allocation4], 4294966784 }
 0x336   :  { %533 = vsyncpa [#allocation3], 1 }
 0x337   :  { %534 = vsyncpa [#allocation6], 1 }
 0x338   :  { %535 = vsyncpa [#allocation9], 1 }
 0x339   :  { %536 = vsyncpa [#allocation4], 1 }

</bundles_post_ra>
